<compile_context>
chip_gen: v5e
topology: v5e:2x2
jax: 0.10.0
libtpu: 0.0.40
codegen_flags: <defaults>
</compile_context>

<pallas_src>
import functools
import math

import jax
import jax.numpy as jnp
from jax.experimental import pallas as pl
from jax.experimental.pallas import tpu as pltpu


# ---------------------------------------------------------------------------
# helpers
# ---------------------------------------------------------------------------
def _round_up(x, m):
    return (x + m - 1) // m * m


def _pick_tile(total, cap):
    """`total` is a multiple of 128; pick the largest tile <= cap dividing it."""
    if total <= cap:
        return total
    for t in (cap, cap // 2, cap // 4, 512, 256, 128):
        if t >= 128 and total % t == 0:
            return t
    return 128


def _choose_m_tiling(m):
    """Row-tile aligned to MXU width / bf16 sublane packing (multiple of 16)."""
    if m >= 1024:
        tm = 512
    elif m >= 256:
        tm = 256
    else:
        tm = _round_up(max(m, 16), 16)
    return _round_up(m, tm), tm


def _vmem_capacity_bytes():
    try:
        cap = getattr(pltpu.get_tpu_info(), "vmem_capacity_bytes", None)
        if cap:
            return int(cap)
    except Exception:
        pass
    return 64 << 20          # conservative default (v7x per-core VMEM)


def _vmem_limit(nbytes_needed):
    cap = _vmem_capacity_bytes()
    budget = max(16 << 20, (cap * 3) // 4)          # leave headroom under cap
    want = int(nbytes_needed * 2) + (4 << 20)
    return int(min(max(want, 16 << 20), budget))


# ---------------------------------------------------------------------------
# Pass 1: tiled conv matmul (patches @ packed weight) + BN partial sums
# ---------------------------------------------------------------------------
def _conv_matmul_kernel(p_ref, w_ref, y_ref, stats_ref, acc_ref):
    """Grid = (M_tiles, N_tiles, K_tiles); K is the last ('arbitrary') axis.

    Accumulates into an f32 VMEM scratch; at the final K step writes the bf16
    conv output tile and per-(M tile, channel) sum / sum-of-squares partials
    used for training-mode BatchNorm statistics.
    """
    k = pl.program_id(2)

    @pl.when(k == 0)
    def _():
        acc_ref[...] = jnp.zeros_like(acc_ref)

    acc_ref[...] += jnp.dot(p_ref[...], w_ref[...],
                            preferred_element_type=jnp.float32)

    @pl.when(k == pl.num_programs(2) - 1)
    def _():
        acc = acc_ref[...]
        y_ref[...] = acc.astype(y_ref.dtype)
        # Padded M rows are exact zeros (zero patches @ W), so no masking is
        # needed for the per-channel partial statistics.
        sums = jnp.sum(acc, axis=0, keepdims=True)          # (1, tn)
        sqs = jnp.sum(acc * acc, axis=0, keepdims=True)     # (1, tn)
        pad_rows = jnp.zeros((6, acc.shape[1]), jnp.float32)
        stats_ref[...] = jnp.concatenate([sums, sqs, pad_rows], axis=0)[None]


# ---------------------------------------------------------------------------
# Pass 2: elementwise normalize (+ residual) (+ ReLU)
# ---------------------------------------------------------------------------
def _bn_apply_kernel(y_ref, ss_ref, *rest, apply_relu, has_residual):
    if has_residual:
        r_ref, o_ref = rest
    else:
        (o_ref,) = rest
    y = y_ref[...].astype(jnp.float32)
    out = y * ss_ref[0:1, :] + ss_ref[1:2, :]
    if has_residual:
        out = out + r_ref[...].astype(jnp.float32)
    if apply_relu:
        out = jnp.maximum(out, 0.0)
    o_ref[...] = out.astype(o_ref.dtype)


# ---------------------------------------------------------------------------
# im2col (wrapper side)
# ---------------------------------------------------------------------------
def _im2col(x_blc, K, stride, pad):
    """(B, Lin, Cin) -> (B*Lout, K*Cin) patches (column index = k*Cin + ci)."""
    B, Lin, Cin = x_blc.shape
    Lout = (Lin + 2 * pad - K) // stride + 1
    xp = jnp.pad(x_blc, ((0, 0), (pad, pad), (0, 0)))
    cols = [xp[:, k: k + (Lout - 1) * stride + 1: stride, :] for k in range(K)]
    patches = jnp.stack(cols, axis=2)               # (B, Lout, K, Cin)
    return patches.reshape(B * Lout, K * Cin), Lout


# ---------------------------------------------------------------------------
# Fused Conv1d -> BatchNorm1d (training stats) [-> +residual] [-> ReLU]
# ---------------------------------------------------------------------------
def conv1d_bn(x_blc, conv_p, stride, pad, residual=None, apply_relu=True):
    """x_blc: (B, Lin, Cin) channels-last bf16 activations."""
    B, Lin, Cin = x_blc.shape
    K, Cout = conv_p["K"], conv_p["Cout"]
    assert Cin == conv_p["Cin"]
    w_mat = conv_p["w"]                              # (KCp, Np) bf16, pre-packed
    KCp, Np = w_mat.shape

    # TODO(synk): the K-tap unfold is still materialized by XLA (im2col); an
    # in-kernel per-tap unfold (strided shifted loads from (B, L, C)) would cut
    # ~K x activation HBM traffic but needs manual strided DMA.
    patches, Lout = _im2col(x_blc, K, stride, pad)   # bf16, (M, K*Cin)
    M = B * Lout
    KC = K * Cin
    Mp, tm = _choose_m_tiling(M)
    patches = jnp.pad(patches, ((0, Mp - M), (0, KCp - KC)))

    tk = _pick_tile(KCp, 1024)
    tn = _pick_tile(Np, 512)
    mt, nt, kt = Mp // tm, Np // tn, KCp // tk

    # ---- pass 1: tiled matmul + BN partial sums ---------------------------
    nbytes1 = (2 * (tm * tk + tk * tn) * 2          # bf16 inputs, dbl-buffered
               + 2 * tm * tn * 2                    # bf16 output tile
               + 2 * 8 * tn * 4                     # stats tile
               + tm * tn * 4)                       # f32 accumulator scratch
    y, stats = pl.pallas_call(
        _conv_matmul_kernel,
        out_shape=(jax.ShapeDtypeStruct((Mp, Np), jnp.bfloat16),
                   jax.ShapeDtypeStruct((mt, 8, Np), jnp.float32)),
        grid_spec=pltpu.PrefetchScalarGridSpec(
            num_scalar_prefetch=0,
            grid=(mt, nt, kt),
            in_specs=[
                pl.BlockSpec((tm, tk), lambda m, n, k: (m, k)),   # patches
                pl.BlockSpec((tk, tn), lambda m, n, k: (k, n)),   # weight
            ],
            out_specs=[
                pl.BlockSpec((tm, tn), lambda m, n, k: (m, n)),       # conv out
                pl.BlockSpec((1, 8, tn), lambda m, n, k: (m, 0, n)),  # partials
            ],
            scratch_shapes=[pltpu.VMEM((tm, tn), jnp.float32)]),
        compiler_params=pltpu.CompilerParams(
            dimension_semantics=("parallel", "parallel", "arbitrary"),
            vmem_limit_bytes=_vmem_limit(nbytes1)),
    )(patches, w_mat)

    # ---- tiny per-channel reduction (XLA, (8, Np)-sized) ------------------
    tot = jnp.sum(stats, axis=0)
    inv_n = 1.0 / float(M)
    mean = tot[0] * inv_n
    var = jnp.maximum(tot[1] * inv_n - mean * mean, 0.0)
    scale = conv_p["gamma"] * jax.lax.rsqrt(var + 1e-5)
    shift = conv_p["beta"] - mean * scale
    ss = jnp.stack([scale, shift], axis=0)           # (2, Np) f32

    # ---- pass 2: normalize (+ residual) (+ ReLU) ---------------------------
    has_res = residual is not None
    inputs = [y, ss]
    in_specs = [pl.BlockSpec((tm, tn), lambda m, n: (m, n)),
                pl.BlockSpec((2, tn), lambda m, n: (0, n))]
    if has_res:
        r2 = residual.reshape(M, Cout).astype(jnp.bfloat16)
        r2 = jnp.pad(r2, ((0, Mp - M), (0, Np - Cout)))
        inputs.append(r2)
        in_specs.append(pl.BlockSpec((tm, tn), lambda m, n: (m, n)))

    kernel2 = functools.partial(_bn_apply_kernel, apply_relu=apply_relu,
                                has_residual=has_res)
    nbytes2 = 2 * ((2 + int(has_res)) * tm * tn * 2 + 2 * tn * 4)
    out = pl.pallas_call(
        kernel2,
        out_shape=jax.ShapeDtypeStruct((Mp, Np), jnp.bfloat16),
        grid_spec=pltpu.PrefetchScalarGridSpec(
            num_scalar_prefetch=0,
            grid=(mt, nt),
            in_specs=in_specs,
            out_specs=pl.BlockSpec((tm, tn), lambda m, n: (m, n)),
        ),
        compiler_params=pltpu.CompilerParams(
            dimension_semantics=("parallel", "parallel"),
            vmem_limit_bytes=_vmem_limit(nbytes2)),
    )(*inputs)

    # TODO(synk): this slice/reshape is one extra XLA pass over the activation
    # per conv; it could be avoided by threading a padded flat layout between
    # blocks.
    return out[:M, :Cout].reshape(B, Lout, Cout)


# ---------------------------------------------------------------------------
# Parameter init (weights pre-packed & padded into bf16 matmul layout ONCE)
# ---------------------------------------------------------------------------
def _init_conv_bn(key, cin, cout, k):
    # Conv bias is intentionally omitted: under training-mode BatchNorm it is
    # exactly cancelled by the mean subtraction.
    bound = 1.0 / math.sqrt(cin * k)
    w = jax.random.uniform(key, (k, cin, cout), jnp.float32, -bound, bound)
    KC = k * cin
    KCp = _round_up(KC, 128)
    Np = _round_up(cout, 128)
    w_mat = jnp.pad(w.reshape(KC, cout), ((0, KCp - KC), (0, Np - cout)))
    return {
        "w": w_mat.astype(jnp.bfloat16),
        "gamma": jnp.pad(jnp.ones((cout,), jnp.float32), (0, Np - cout)),
        "beta": jnp.zeros((Np,), jnp.float32),
        "K": k, "Cin": cin, "Cout": cout,
    }


def init_resnet_layer(key, num_blocks, in_channels, out_channels,
                      kernel_size, stride, padding):
    cfgs = [(in_channels, out_channels, kernel_size, stride, padding)]
    cfgs += [(out_channels, out_channels, 3, 1, 1)] * (num_blocks - 1)
    blocks = []
    for (cin, cout, k, s, p) in cfgs:
        key, k1, k2, k3 = jax.random.split(key, 4)
        has_sc = (cin != cout) or ((k, s, p) != (3, 1, 1))
        block = {
            "cfg": (k, s, p, has_sc),
            "conv1": _init_conv_bn(k1, cin, cout, k),
            "conv2": _init_conv_bn(k2, cout, cout, 3),
        }
        if has_sc:
            block["sc"] = _init_conv_bn(k3, cin, cout, k)
        blocks.append(block)
    return blocks


# ---------------------------------------------------------------------------
# Forward pass (matches the PyTorch module semantics, training-mode BN)
# ---------------------------------------------------------------------------
def basic_block_forward(block, x_blc):
    k, s, p, has_sc = block["cfg"]
    # conv1 -> BN -> ReLU
    h = conv1d_bn(x_blc, block["conv1"], s, p, residual=None, apply_relu=True)
    # shortcut branch
    if has_sc:
        sc = conv1d_bn(x_blc, block["sc"], s, p, residual=None,
                       apply_relu=False)
    else:
        sc = x_blc
    # conv2 -> BN -> (+ shortcut) -> ReLU (residual/ReLU fused in pass 2)
    return conv1d_bn(h, block["conv2"], 1, 1, residual=sc, apply_relu=True)


def resnet_layer_forward(params, x_ncl):
    """x_ncl: (B, C_in, L) as in PyTorch; returns (B, C_out, L_out) f32."""
    h = jnp.transpose(x_ncl, (0, 2, 1)).astype(jnp.bfloat16)   # (B, L, C)
    for block in params:
        h = basic_block_forward(block, h)
    return jnp.transpose(h, (0, 2, 1)).astype(jnp.float32)


# ---------------------------------------------------------------------------
if __name__ == "__main__":
    B, C_IN, C_OUT, L = 2, 4, 8, 16
    NUM_BLOCKS, K, S, P = 2, 5, 2, 2

    key = jax.random.PRNGKey(0)
    key, kx = jax.random.split(key)
    params = init_resnet_layer(key, NUM_BLOCKS, C_IN, C_OUT, K, S, P)
    x = jax.random.normal(kx, (B, C_IN, L), jnp.float32)

    fwd = jax.jit(lambda inp: resnet_layer_forward(params, inp))
    out = jax.block_until_ready(fwd(x))

    L_out = (L + 2 * P - K) // S + 1          # 8
    assert out.shape == (B, C_OUT, L_out), out.shape
    assert bool(jnp.all(jnp.isfinite(out)))
    # TODO(synk): eval-mode BatchNorm (running stats) not implemented; this
    # matches the training-mode forward of a freshly constructed PyTorch module.
    print("KERNEL_OK")
</pallas_src>

<mosaic_0001>
module attributes {stable_mosaic.version = 11 : i64} {
  func.func @_conv_matmul_kernel(%arg0: i32, %arg1: i32, %arg2: i32, %arg3: memref<16x128xbf16, #tpu.memory_space<vmem>>, %arg4: memref<128x128xbf16, #tpu.memory_space<vmem>>, %arg5: memref<16x128xbf16, #tpu.memory_space<vmem>>, %arg6: memref<1x8x128xf32, #tpu.memory_space<vmem>>, %arg7: memref<16x128xf32, #tpu.memory_space<vmem>>) attributes {dimension_semantics = [#tpu.dimension_semantics<parallel>, #tpu.dimension_semantics<parallel>, #tpu.dimension_semantics<arbitrary>], iteration_bounds = array<i64: 1, 1, 1>, scalar_prefetch = 0 : i64, scratch_operands = 1 : i64, tpu.core_type = #tpu.core_type<tc>, window_params = [{transform_indices = @transform_0, window_bounds = array<i64: 16, 128>}, {transform_indices = @transform_1, window_bounds = array<i64: 128, 128>}, {transform_indices = @transform_2, window_bounds = array<i64: 16, 128>}, {transform_indices = @transform_3, window_bounds = array<i64: 1, 8, 128>}]} {
    %c0_i32 = arith.constant 0 : i32
    %0 = arith.cmpi eq, %arg2, %c0_i32 : i32
    %1 = arith.extui %0 : i1 to i32
    %c0_i32_0 = arith.constant 0 : i32
    %2 = arith.cmpi ne, %1, %c0_i32_0 : i32
    scf.if %2 {
      %cst_10 = arith.constant 0.000000e+00 : f32
      %12 = vector.broadcast %cst_10 : f32 to vector<16x128xf32>
      %c0_11 = arith.constant 0 : index
      %c0_12 = arith.constant 0 : index
      %13 = vector.load %arg7[%c0_11, %c0_12] : memref<16x128xf32, #tpu.memory_space<vmem>>, vector<16x128xf32>
      tpu.vector_store %arg7[%c0_11, %c0_12], %12 {strides = array<i32>} : memref<16x128xf32, #tpu.memory_space<vmem>>, vector<16x128xf32>,
    } else {
    }
    %c0 = arith.constant 0 : index
    %c0_1 = arith.constant 0 : index
    %3 = vector.load %arg7[%c0, %c0_1] : memref<16x128xf32, #tpu.memory_space<vmem>>, vector<16x128xf32>
    %c0_2 = arith.constant 0 : index
    %c0_3 = arith.constant 0 : index
    %4 = vector.load %arg3[%c0_2, %c0_3] : memref<16x128xbf16, #tpu.memory_space<vmem>>, vector<16x128xbf16>
    %c0_4 = arith.constant 0 : index
    %c0_5 = arith.constant 0 : index
    %5 = vector.load %arg4[%c0_4, %c0_5] : memref<128x128xbf16, #tpu.memory_space<vmem>>, vector<128x128xbf16>
    %cst = arith.constant dense<0.000000e+00> : vector<16x128xf32>
    %6 = tpu.matmul %4, %5, %cst {dimension_numbers = #tpu.dot_dimension_numbers<[1], [0], [0], [1], [0, 0, 1, 1], [], []>} : vector<16x128xbf16>, vector<128x128xbf16>, vector<16x128xf32> -> vector<16x128xf32>
    %7 = arith.addf %3, %6 : vector<16x128xf32>
    %c0_6 = arith.constant 0 : index
    %c0_7 = arith.constant 0 : index
    %8 = vector.load %arg7[%c0_6, %c0_7] : memref<16x128xf32, #tpu.memory_space<vmem>>, vector<16x128xf32>
    tpu.vector_store %arg7[%c0_6, %c0_7], %7 {strides = array<i32>} : memref<16x128xf32, #tpu.memory_space<vmem>>, vector<16x128xf32>,
    %c0_i32_8 = arith.constant 0 : i32
    %9 = arith.cmpi eq, %arg2, %c0_i32_8 : i32
    %10 = arith.extui %9 : i1 to i32
    %c0_i32_9 = arith.constant 0 : i32
    %11 = arith.cmpi ne, %10, %c0_i32_9 : i32
    scf.if %11 {
      %c0_10 = arith.constant 0 : index
      %c0_11 = arith.constant 0 : index
      %12 = vector.load %arg7[%c0_10, %c0_11] : memref<16x128xf32, #tpu.memory_space<vmem>>, vector<16x128xf32>
      %13 = arith.truncf %12 : vector<16x128xf32> to vector<16x128xbf16>
      %c0_12 = arith.constant 0 : index
      %c0_13 = arith.constant 0 : index
      %14 = vector.load %arg5[%c0_12, %c0_13] : memref<16x128xbf16, #tpu.memory_space<vmem>>, vector<16x128xbf16>
      tpu.vector_store %arg5[%c0_12, %c0_13], %13 {strides = array<i32>} : memref<16x128xbf16, #tpu.memory_space<vmem>>, vector<16x128xbf16>,
      %cst_14 = arith.constant dense<0.000000e+00> : vector<128xf32>
      %15 = vector.multi_reduction <add>, %12, %cst_14 [0] : vector<16x128xf32> to vector<128xf32>
      %16 = vector.shape_cast %15 : vector<128xf32> to vector<1x128xf32>
      %17 = arith.mulf %12, %12 : vector<16x128xf32>
      %cst_15 = arith.constant dense<0.000000e+00> : vector<128xf32>
      %18 = vector.multi_reduction <add>, %17, %cst_15 [0] : vector<16x128xf32> to vector<128xf32>
      %19 = vector.shape_cast %18 : vector<128xf32> to vector<1x128xf32>
      %cst_16 = arith.constant 0.000000e+00 : f32
      %20 = vector.broadcast %cst_16 : f32 to vector<6x128xf32>
      %21 = tpu.concatenate %16, %19, %20 in 0 : vector<1x128xf32>, vector<1x128xf32>, vector<6x128xf32> -> vector<8x128xf32>
      %22 = vector.shape_cast %21 : vector<8x128xf32> to vector<1x8x128xf32>
      %c0_17 = arith.constant 0 : index
      %c0_18 = arith.constant 0 : index
      %c0_19 = arith.constant 0 : index
      %23 = vector.load %arg6[%c0_17, %c0_18, %c0_19] : memref<1x8x128xf32, #tpu.memory_space<vmem>>, vector<1x8x128xf32>
      tpu.vector_store %arg6[%c0_17, %c0_18, %c0_19], %22 {strides = array<i32>} : memref<1x8x128xf32, #tpu.memory_space<vmem>>, vector<1x8x128xf32>,
    } else {
    }
    return
  }
  func.func @transform_0(%arg0: i32, %arg1: i32, %arg2: i32) -> (i32, i32) {
    %c0_i32 = arith.constant 0 : i32
    return %arg0, %arg2 : i32, i32
  }
  func.func @transform_1(%arg0: i32, %arg1: i32, %arg2: i32) -> (i32, i32) {
    %c0_i32 = arith.constant 0 : i32
    return %arg2, %arg1 : i32, i32
  }
  func.func @transform_2(%arg0: i32, %arg1: i32, %arg2: i32) -> (i32, i32) {
    %c0_i32 = arith.constant 0 : i32
    return %arg0, %arg1 : i32, i32
  }
  func.func @transform_3(%arg0: i32, %arg1: i32, %arg2: i32) -> (i32, i32, i32) {
    %c0_i32 = arith.constant 0 : i32
    %c0_i32_0 = arith.constant 0 : i32
    return %arg0, %c0_i32, %arg1 : i32, i32, i32
  }
}

module attributes {stable_mosaic.version = 11 : i64} {
  func.func @_bn_apply_kernel(%arg0: i32, %arg1: i32, %arg2: memref<16x128xbf16, #tpu.memory_space<vmem>>, %arg3: memref<2x128xf32, #tpu.memory_space<vmem>>, %arg4: memref<16x128xbf16, #tpu.memory_space<vmem>>) attributes {dimension_semantics = [#tpu.dimension_semantics<parallel>, #tpu.dimension_semantics<parallel>], iteration_bounds = array<i64: 1, 1>, scalar_prefetch = 0 : i64, scratch_operands = 0 : i64, tpu.core_type = #tpu.core_type<tc>, window_params = [{transform_indices = @transform_0, window_bounds = array<i64: 16, 128>}, {transform_indices = @transform_1, window_bounds = array<i64: 2, 128>}, {transform_indices = @transform_2, window_bounds = array<i64: 16, 128>}]} {
    %c0 = arith.constant 0 : index
    %c0_0 = arith.constant 0 : index
    %0 = vector.load %arg2[%c0, %c0_0] : memref<16x128xbf16, #tpu.memory_space<vmem>>, vector<16x128xbf16>
    %1 = arith.extf %0 : vector<16x128xbf16> to vector<16x128xf32>
    %c0_1 = arith.constant 0 : index
    %c0_2 = arith.constant 0 : index
    %2 = vector.load %arg3[%c0_1, %c0_2] : memref<2x128xf32, #tpu.memory_space<vmem>>, vector<1x128xf32>
    %3 = vector.broadcast %2 : vector<1x128xf32> to vector<16x128xf32>
    %4 = arith.mulf %1, %3 : vector<16x128xf32>
    %c1 = arith.constant 1 : index
    %c0_3 = arith.constant 0 : index
    %5 = vector.load %arg3[%c1, %c0_3] : memref<2x128xf32, #tpu.memory_space<vmem>>, vector<1x128xf32>
    %6 = vector.broadcast %5 : vector<1x128xf32> to vector<16x128xf32>
    %7 = arith.addf %4, %6 : vector<16x128xf32>
    %cst = arith.constant 0.000000e+00 : f32
    %8 = vector.broadcast %cst : f32 to vector<16x128xf32>
    %9 = arith.maximumf %7, %8 : vector<16x128xf32>
    %10 = arith.truncf %9 : vector<16x128xf32> to vector<16x128xbf16>
    %c0_4 = arith.constant 0 : index
    %c0_5 = arith.constant 0 : index
    %11 = vector.load %arg4[%c0_4, %c0_5] : memref<16x128xbf16, #tpu.memory_space<vmem>>, vector<16x128xbf16>
    tpu.vector_store %arg4[%c0_4, %c0_5], %10 {strides = array<i32>} : memref<16x128xbf16, #tpu.memory_space<vmem>>, vector<16x128xbf16>,
    return
  }
  func.func @transform_0(%arg0: i32, %arg1: i32) -> (i32, i32) {
    %c0_i32 = arith.constant 0 : i32
    return %arg0, %arg1 : i32, i32
  }
  func.func @transform_1(%arg0: i32, %arg1: i32) -> (i32, i32) {
    %c0_i32 = arith.constant 0 : i32
    %c0_i32_0 = arith.constant 0 : i32
    return %c0_i32, %arg1 : i32, i32
  }
  func.func @transform_2(%arg0: i32, %arg1: i32) -> (i32, i32) {
    %c0_i32 = arith.constant 0 : i32
    return %arg0, %arg1 : i32, i32
  }
}

module attributes {stable_mosaic.version = 11 : i64} {
  func.func @_bn_apply_kernel(%arg0: i32, %arg1: i32, %arg2: memref<16x128xbf16, #tpu.memory_space<vmem>>, %arg3: memref<2x128xf32, #tpu.memory_space<vmem>>, %arg4: memref<16x128xbf16, #tpu.memory_space<vmem>>) attributes {dimension_semantics = [#tpu.dimension_semantics<parallel>, #tpu.dimension_semantics<parallel>], iteration_bounds = array<i64: 1, 1>, scalar_prefetch = 0 : i64, scratch_operands = 0 : i64, tpu.core_type = #tpu.core_type<tc>, window_params = [{transform_indices = @transform_0, window_bounds = array<i64: 16, 128>}, {transform_indices = @transform_1, window_bounds = array<i64: 2, 128>}, {transform_indices = @transform_2, window_bounds = array<i64: 16, 128>}]} {
    %c0 = arith.constant 0 : index
    %c0_0 = arith.constant 0 : index
    %0 = vector.load %arg2[%c0, %c0_0] : memref<16x128xbf16, #tpu.memory_space<vmem>>, vector<16x128xbf16>
    %1 = arith.extf %0 : vector<16x128xbf16> to vector<16x128xf32>
    %c0_1 = arith.constant 0 : index
    %c0_2 = arith.constant 0 : index
    %2 = vector.load %arg3[%c0_1, %c0_2] : memref<2x128xf32, #tpu.memory_space<vmem>>, vector<1x128xf32>
    %3 = vector.broadcast %2 : vector<1x128xf32> to vector<16x128xf32>
    %4 = arith.mulf %1, %3 : vector<16x128xf32>
    %c1 = arith.constant 1 : index
    %c0_3 = arith.constant 0 : index
    %5 = vector.load %arg3[%c1, %c0_3] : memref<2x128xf32, #tpu.memory_space<vmem>>, vector<1x128xf32>
    %6 = vector.broadcast %5 : vector<1x128xf32> to vector<16x128xf32>
    %7 = arith.addf %4, %6 : vector<16x128xf32>
    %8 = arith.truncf %7 : vector<16x128xf32> to vector<16x128xbf16>
    %c0_4 = arith.constant 0 : index
    %c0_5 = arith.constant 0 : index
    %9 = vector.load %arg4[%c0_4, %c0_5] : memref<16x128xbf16, #tpu.memory_space<vmem>>, vector<16x128xbf16>
    tpu.vector_store %arg4[%c0_4, %c0_5], %8 {strides = array<i32>} : memref<16x128xbf16, #tpu.memory_space<vmem>>, vector<16x128xbf16>,
    return
  }
  func.func @transform_0(%arg0: i32, %arg1: i32) -> (i32, i32) {
    %c0_i32 = arith.constant 0 : i32
    return %arg0, %arg1 : i32, i32
  }
  func.func @transform_1(%arg0: i32, %arg1: i32) -> (i32, i32) {
    %c0_i32 = arith.constant 0 : i32
    %c0_i32_0 = arith.constant 0 : i32
    return %c0_i32, %arg1 : i32, i32
  }
  func.func @transform_2(%arg0: i32, %arg1: i32) -> (i32, i32) {
    %c0_i32 = arith.constant 0 : i32
    return %arg0, %arg1 : i32, i32
  }
}

module attributes {stable_mosaic.version = 11 : i64} {
  func.func @_bn_apply_kernel(%arg0: i32, %arg1: i32, %arg2: memref<16x128xbf16, #tpu.memory_space<vmem>>, %arg3: memref<2x128xf32, #tpu.memory_space<vmem>>, %arg4: memref<16x128xbf16, #tpu.memory_space<vmem>>, %arg5: memref<16x128xbf16, #tpu.memory_space<vmem>>) attributes {dimension_semantics = [#tpu.dimension_semantics<parallel>, #tpu.dimension_semantics<parallel>], iteration_bounds = array<i64: 1, 1>, scalar_prefetch = 0 : i64, scratch_operands = 0 : i64, tpu.core_type = #tpu.core_type<tc>, window_params = [{transform_indices = @transform_0, window_bounds = array<i64: 16, 128>}, {transform_indices = @transform_1, window_bounds = array<i64: 2, 128>}, {transform_indices = @transform_2, window_bounds = array<i64: 16, 128>}, {transform_indices = @transform_3, window_bounds = array<i64: 16, 128>}]} {
    %c0 = arith.constant 0 : index
    %c0_0 = arith.constant 0 : index
    %0 = vector.load %arg2[%c0, %c0_0] : memref<16x128xbf16, #tpu.memory_space<vmem>>, vector<16x128xbf16>
    %1 = arith.extf %0 : vector<16x128xbf16> to vector<16x128xf32>
    %c0_1 = arith.constant 0 : index
    %c0_2 = arith.constant 0 : index
    %2 = vector.load %arg3[%c0_1, %c0_2] : memref<2x128xf32, #tpu.memory_space<vmem>>, vector<1x128xf32>
    %3 = vector.broadcast %2 : vector<1x128xf32> to vector<16x128xf32>
    %4 = arith.mulf %1, %3 : vector<16x128xf32>
    %c1 = arith.constant 1 : index
    %c0_3 = arith.constant 0 : index
    %5 = vector.load %arg3[%c1, %c0_3] : memref<2x128xf32, #tpu.memory_space<vmem>>, vector<1x128xf32>
    %6 = vector.broadcast %5 : vector<1x128xf32> to vector<16x128xf32>
    %7 = arith.addf %4, %6 : vector<16x128xf32>
    %c0_4 = arith.constant 0 : index
    %c0_5 = arith.constant 0 : index
    %8 = vector.load %arg4[%c0_4, %c0_5] : memref<16x128xbf16, #tpu.memory_space<vmem>>, vector<16x128xbf16>
    %9 = arith.extf %8 : vector<16x128xbf16> to vector<16x128xf32>
    %10 = arith.addf %7, %9 : vector<16x128xf32>
    %cst = arith.constant 0.000000e+00 : f32
    %11 = vector.broadcast %cst : f32 to vector<16x128xf32>
    %12 = arith.maximumf %10, %11 : vector<16x128xf32>
    %13 = arith.truncf %12 : vector<16x128xf32> to vector<16x128xbf16>
    %c0_6 = arith.constant 0 : index
    %c0_7 = arith.constant 0 : index
    %14 = vector.load %arg5[%c0_6, %c0_7] : memref<16x128xbf16, #tpu.memory_space<vmem>>, vector<16x128xbf16>
    tpu.vector_store %arg5[%c0_6, %c0_7], %13 {strides = array<i32>} : memref<16x128xbf16, #tpu.memory_space<vmem>>, vector<16x128xbf16>,
    return
  }
  func.func @transform_0(%arg0: i32, %arg1: i32) -> (i32, i32) {
    %c0_i32 = arith.constant 0 : i32
    return %arg0, %arg1 : i32, i32
  }
  func.func @transform_1(%arg0: i32, %arg1: i32) -> (i32, i32) {
    %c0_i32 = arith.constant 0 : i32
    %c0_i32_0 = arith.constant 0 : i32
    return %c0_i32, %arg1 : i32, i32
  }
  func.func @transform_2(%arg0: i32, %arg1: i32) -> (i32, i32) {
    %c0_i32 = arith.constant 0 : i32
    return %arg0, %arg1 : i32, i32
  }
  func.func @transform_3(%arg0: i32, %arg1: i32) -> (i32, i32) {
    %c0_i32 = arith.constant 0 : i32
    return %arg0, %arg1 : i32, i32
  }
}

</mosaic_0001>

<bundles_post_ra>
// kernel: _lambda_.11
= control target key start
LH: loop header
LB: loop body
LE: loop exit
PB: predicated region body
PF: predicated region fallthrough
CT: control target
= control target key end

     0   :  { %s71_s0 = inlined_call_operand.vmem [shape: bf16[16,128], index: 0, kind: input, shape index: {}]   ;;  %s72_s1 = inlined_call_operand.vmem [shape: f32[2,128], index: 1, kind: input, shape index: {}]   ;;  %s73_s2 = inlined_call_operand.vmem [shape: bf16[16,128], index: 2, kind: output, shape index: {}]  }
   0x1   :  { %v34_v0 = vld [vmem:[%s71_s0] sm:$0xff]  }
   0x2   :  { %v42_v1 = vld [vmem:[%s72_s1] ss:$0 sm:$0xff]  ;;  %v35_v2 = vunpack.c.l.bf16 %v34_v0  ;;  %v36_v3 = vunpack.c.h.bf16 %v34_v0  ;;  %v43_v4 = vld [vmem:[%s72_s1 + $0x1] ss:$0 sm:$0xff] }
   0x4   :  { %v17_v5 = vmul.f32 %v42_v1, %v35_v2  ;;  %v18_v6 = vmul.f32 %v42_v1, %v36_v3 }
   0x6   :  { %v21_v7 = vadd.f32 %v43_v4, %v17_v5  ;;  %v22_v8 = vadd.f32 %v43_v4, %v18_v6 }
   0x8   :  { %v23_v9 = vmax.f32 %v21_v7, 0.0  ;;  %v24_v10 = vmax.f32 %v22_v8, 0.0 }
   0xa   :  { %v40_v11 = vpack.c.bf16 %v24_v10, %v23_v9 }
   0xc   :  { %41 = vst [vmem:[%s73_s2] sm:$0xff] %v40_v11  }

// kernel: _lambda_.10
= control target key start
LH: loop header
LB: loop body
LE: loop exit
PB: predicated region body
PF: predicated region fallthrough
CT: control target
= control target key end

     0   :  { %vm136_vm0 = vcmask 1040384   ;;  %vm138_vm1 = vcmask 1041408   ;;  %s252_s1 = inlined_call_operand.vmem [shape: bf16[128,128], index: 1, kind: input, shape index: {}]   ;;  %s253_s0 = inlined_call_operand.vmem [shape: bf16[16,128], index: 0, kind: input, shape index: {}]   ;;  %s254_s2 = inlined_call_operand.vmem [shape: bf16[16,128], index: 2, kind: output, shape index: {0}]   ;;  %s255_s3 = inlined_call_operand.vmem [shape: f32[1,8,128], index: 3, kind: output, shape index: {1}]  }
   0x1   :  { %v193_v0 = vld [vmem:[%s252_s1 + $0x38] sm:$0xff]  ;;  %v192_v1 = vld [vmem:[%s252_s1 + $0x30] sm:$0xff]  ;;  %v191_v2 = vld [vmem:[%s252_s1 + $0x28] sm:$0xff] }
   0x2   :  { %93 = vmatpush.bf16.msra.mxu0 %v193_v0  ;;  %v190_v3 = vld [vmem:[%s252_s1 + $0x20] sm:$0xff]  ;;  %v189_v4 = vld [vmem:[%s252_s1 + $0x18] sm:$0xff]  ;;  %v188_v5 = vld [vmem:[%s252_s1 + $0x10] sm:$0xff] }
   0x3   :  { %v187_v6 = vld [vmem:[%s252_s1 + $0x8] sm:$0xff]  ;;  %v186_v7 = vld [vmem:[%s252_s1] sm:$0xff] }
   0x4   :  { %v185_v8 = vld [vmem:[%s253_s0] sm:$0xff] }
   0x6   :  { %94 = vmatpush.bf16.msra.mxu0 %v192_v1 }
   0xa   :  { %95 = vmatpush.bf16.msra.mxu0 %v191_v2 }
   0xe   :  { %96 = vmatpush.bf16.msra.mxu0 %v190_v3 }
  0x12   :  { %97 = vmatpush.bf16.msra.mxu0 %v189_v4 }
  0x16   :  { %98 = vmatpush.bf16.msra.mxu0 %v188_v5 }
  0x1a   :  { %99 = vmatpush.bf16.msra.mxu0 %v187_v6 }
  0x1e   :  { %100 = vmatpush.bf16.msra.mxu0 %v186_v7 }
  0x21   :  { %101 = vmatmul.bf16.vlgmr.msra.gmra.mxu0 %v185_v8 }
  0x9e   :  { %v102_v9 = vpop.f32.mrf.mxu0 }
  0x9f   :  { %v127_v11 = vmul.f32 %v102_v9, %v102_v9 }
  0xa6   :  { %v104_v10 = vpop.f32.mrf.mxu0 }
  0xa7   :  { %v197_v12 = vpack.c.bf16 %v104_v10, %v102_v9  ;;  %v120_v13 = vadd.f32 %v104_v10, %v102_v9  ;;  %v128_v14 = vmul.f32 %v104_v10, %v104_v10 }
  0xa9   :  { %198 = vst [vmem:[%s254_s2] sm:$0xff] %v197_v12   ;;  %v121_v15 = vrot.slane %v120_v13, 4  ;;  %v129_v16 = vadd.f32 %v128_v14, %v127_v11 }
  0xab   :  { %v122_v17 = vadd.f32 %v121_v15, %v120_v13  ;;  %v130_v18 = vrot.slane %v129_v16, 4 }
  0xad   :  { %v123_v19 = vrot.slane %v122_v17, 2  ;;  %v131_v20 = vadd.f32 %v130_v18, %v129_v16 }
  0xaf   :  { %v124_v21 = vadd.f32 %v123_v19, %v122_v17  ;;  %v132_v22 = vrot.slane %v131_v20, 2 }
  0xb1   :  { %v125_v23 = vrot.slane %v124_v21, 1  ;;  %v133_v24 = vadd.f32 %v132_v22, %v131_v20 }
  0xb3   :  { %v134_v25 = vrot.slane %v133_v24, 1  ;;  %v126_v26 = vadd.f32 %v125_v23, %v124_v21 }
  0xb5   :  { %v135_v27 = vadd.f32 %v134_v25, %v133_v24 }
  0xb7   :  { %v137_v28 = vsel %vm136_vm0, %v126_v26, %v135_v27 }
  0xb8   :  { %v139_v29 = vsel %vm138_vm1, %v137_v28, 0.0 }
  0xb9   :  { %140 = vst [vmem:[%s255_s3] sm:$0xff] %v139_v29 }

// kernel: _lambda_.13
= control target key start
LH: loop header
LB: loop body
LE: loop exit
PB: predicated region body
PF: predicated region fallthrough
CT: control target
= control target key end

     0   :  { %s69_s0 = inlined_call_operand.vmem [shape: bf16[16,128], index: 0, kind: input, shape index: {}]   ;;  %s70_s1 = inlined_call_operand.vmem [shape: f32[2,128], index: 1, kind: input, shape index: {}]   ;;  %s71_s2 = inlined_call_operand.vmem [shape: bf16[16,128], index: 2, kind: output, shape index: {}]  }
   0x1   :  { %v32_v0 = vld [vmem:[%s69_s0] sm:$0xff]  }
   0x2   :  { %v40_v1 = vld [vmem:[%s70_s1] ss:$0 sm:$0xff]  ;;  %v33_v2 = vunpack.c.l.bf16 %v32_v0  ;;  %v34_v3 = vunpack.c.h.bf16 %v32_v0  ;;  %v41_v4 = vld [vmem:[%s70_s1 + $0x1] ss:$0 sm:$0xff] }
   0x4   :  { %v17_v5 = vmul.f32 %v40_v1, %v33_v2  ;;  %v18_v6 = vmul.f32 %v40_v1, %v34_v3 }
   0x6   :  { %v21_v7 = vadd.f32 %v41_v4, %v17_v5  ;;  %v22_v8 = vadd.f32 %v41_v4, %v18_v6 }
   0x8   :  { %v38_v9 = vpack.c.bf16 %v22_v8, %v21_v7 }
   0xa   :  { %39 = vst [vmem:[%s71_s2] sm:$0xff] %v38_v9  }

// kernel: _lambda_.15
= control target key start
LH: loop header
LB: loop body
LE: loop exit
PB: predicated region body
PF: predicated region fallthrough
CT: control target
= control target key end

     0   :  { %s92_s0 = inlined_call_operand.vmem [shape: bf16[16,128], index: 0, kind: input, shape index: {}]   ;;  %s93_s1 = inlined_call_operand.vmem [shape: f32[2,128], index: 1, kind: input, shape index: {}]   ;;  %s94_s2 = inlined_call_operand.vmem [shape: bf16[16,128], index: 2, kind: input, shape index: {}]   ;;  %s95_s3 = inlined_call_operand.vmem [shape: bf16[16,128], index: 3, kind: output, shape index: {}]  }
   0x1   :  { %v43_v0 = vld [vmem:[%s92_s0] sm:$0xff]  }
   0x2   :  { %v55_v1 = vld [vmem:[%s93_s1] ss:$0 sm:$0xff]  ;;  %v44_v2 = vunpack.c.l.bf16 %v43_v0  ;;  %v45_v3 = vunpack.c.h.bf16 %v43_v0  ;;  %v56_v4 = vld [vmem:[%s93_s1 + $0x1] ss:$0 sm:$0xff] }
   0x3   :  { %v47_v5 = vld [vmem:[%s94_s2] sm:$0xff]  }
   0x4   :  { %v20_v6 = vmul.f32 %v55_v1, %v44_v2  ;;  %v21_v7 = vmul.f32 %v55_v1, %v45_v3  ;;  %v48_v8 = vunpack.c.l.bf16 %v47_v5  ;;  %v49_v9 = vunpack.c.h.bf16 %v47_v5 }
   0x6   :  { %v24_v10 = vadd.f32 %v56_v4, %v20_v6  ;;  %v25_v11 = vadd.f32 %v56_v4, %v21_v7 }
   0x8   :  { %v30_v12 = vadd.f32 %v48_v8, %v24_v10  ;;  %v31_v13 = vadd.f32 %v49_v9, %v25_v11 }
   0xa   :  { %v32_v14 = vmax.f32 %v30_v12, 0.0  ;;  %v33_v15 = vmax.f32 %v31_v13, 0.0 }
   0xc   :  { %v53_v16 = vpack.c.bf16 %v33_v15, %v32_v14 }
   0xe   :  { %54 = vst [vmem:[%s95_s3] sm:$0xff] %v53_v16  }

</bundles_post_ra>
